<compile_context>
chip_gen: v7x
topology: tpu7x:2x2x1
jax: 0.10.0
libtpu: 0.0.40
codegen_flags: <defaults>
</compile_context>

<pallas_src>
import functools

import jax
import jax.numpy as jnp
from jax.experimental import pallas as pl
from jax.experimental.pallas import tpu as pltpu


def _fusion_kernel(f1_ref, f2_ref, o_ref, *, alpha):
    # Pure elementwise VPU work; the kernel is HBM-bandwidth bound so doing the
    # arithmetic in f32 (casts + 2 muls + 1 add) is free and handles bf16 /
    # integer inputs correctly. alpha is a trace-time Python scalar.
    a = jnp.float32(alpha)
    b = jnp.float32(1.0 - alpha)
    x = f1_ref[...].astype(jnp.float32)
    y = f2_ref[...].astype(jnp.float32)
    o_ref[...] = (a * x + b * y).astype(o_ref.dtype)


def _pick_target_tile_bytes():
    """Per-buffer tile budget keyed on chip generation (HBM BW / scoped VMEM)."""
    try:
        kind = jax.devices()[0].device_kind.lower()
    except Exception:
        return 2 << 20
    if any(tag in kind for tag in ("v2", "v3", "v4", "v5")):
        # Slower HBM (per-step overhead already <10% at 1 MiB tiles) and a
        # 16 MiB default scoped-VMEM budget -> stay at 2 MiB per buffer.
        return 2 << 20
    # v6e / v7x: 4 MiB per buffer (24 MiB total double-buffered) amortizes the
    # ~0.35 us/step grid overhead at 1.4-3.2 TB/s and still fits v7x's 64 MiB.
    return 4 << 20


def _choose_block_rows(rows, pack, bytes_per_row, target_tile_bytes):
    """Rows per block: byte-budgeted, sublane-pack aligned, megacore friendly."""
    if rows <= pack:
        return rows  # full first dim is always a legal (tiny) block
    block_rows = max(1, target_tile_bytes // bytes_per_row)
    block_rows = max(pack, (block_rows // pack) * pack)
    block_rows = min(block_rows, rows)
    num_blocks = pl.cdiv(rows, block_rows)
    # v7x has two TensorCores sharing the "parallel" axis: never leave one idle.
    if num_blocks < 2:
        block_rows = max(pack, (pl.cdiv(rows, 2) // pack) * pack)
        num_blocks = pl.cdiv(rows, block_rows)
    # For small grids prefer an even block count so the 2-way split balances.
    if 2 < num_blocks <= 16 and num_blocks % 2 == 1:
        cand = max(pack, (pl.cdiv(rows, num_blocks + 1) // pack) * pack)
        if pl.cdiv(rows, cand) % 2 == 0:
            block_rows = cand
    return block_rows


def _fusion_2d(f1, f2, alpha, out_dtype, target_tile_bytes):
    """Run the fusion kernel on a lane-dense (rows, lane_w) slab."""
    rows, lane_w = f1.shape
    in_item = jnp.dtype(f1.dtype).itemsize
    out_item = jnp.dtype(out_dtype).itemsize
    # Sublane packing: f32 -> 8 rows/vreg, bf16 -> 16, int8 -> 32.  Use the
    # strictest requirement among input and output dtypes so stores stay dense.
    pack = max(8, 32 // min(in_item, out_item))
    bytes_per_row = lane_w * max(in_item, out_item)
    block_rows = _choose_block_rows(rows, pack, bytes_per_row, target_tile_bytes)
    grid = (pl.cdiv(rows, block_rows),)
    spec = pl.BlockSpec((block_rows, lane_w), lambda i: (i, 0))

    # 3 operands, each double-buffered by the default Pallas pipeline.
    vmem_needed = 2 * block_rows * lane_w * (2 * in_item + out_item)
    vmem_limit = int(min(max(2 * vmem_needed + (2 << 20), 16 << 20), 48 << 20))

    n = rows * lane_w
    return pl.pallas_call(
        functools.partial(_fusion_kernel, alpha=float(alpha)),
        out_shape=jax.ShapeDtypeStruct((rows, lane_w), out_dtype),
        grid_spec=pltpu.PrefetchScalarGridSpec(
            num_scalar_prefetch=0,
            grid=grid,
            in_specs=[spec, spec],
            out_specs=spec,
        ),
        compiler_params=pltpu.CompilerParams(
            dimension_semantics=("parallel",),
            vmem_limit_bytes=vmem_limit,
        ),
        cost_estimate=pl.CostEstimate(
            flops=3 * n,
            transcendentals=0,
            bytes_accessed=n * (2 * in_item + out_item),
        ),
    )(f1, f2)


def fmean_fusion(feature_1, feature_2, alpha, *, target_tile_bytes=None):
    """alpha * feature_1 + (1 - alpha) * feature_2 via a tiled Pallas kernel."""
    assert feature_1.shape == feature_2.shape
    assert feature_1.dtype == feature_2.dtype
    orig_shape = feature_1.shape
    in_dtype = feature_1.dtype
    # PyTorch weak-scalar promotion: float * int tensor -> float32 output;
    # floating inputs keep their dtype.
    out_dtype = in_dtype if jnp.issubdtype(in_dtype, jnp.floating) else jnp.float32
    n = feature_1.size
    if n == 0:
        return jnp.zeros(orig_shape, out_dtype)
    if target_tile_bytes is None:
        target_tile_bytes = _pick_target_tile_bytes()

    # Pick the widest lane extent that divides n so the reshape is copy-free.
    lane_w = None
    for cand in (2048, 1024, 512, 256, 128):
        if n % cand == 0:
            lane_w = cand
            break
    if lane_w is not None:
        rows = n // lane_w
        out = _fusion_2d(
            feature_1.reshape(rows, lane_w),
            feature_2.reshape(rows, lane_w),
            alpha, out_dtype, target_tile_bytes,
        )
        return out.reshape(orig_shape)

    # Ragged element count (rare): run the 128-divisible bulk through the fast
    # slab kernel and compute the <128-element tail with plain XLA. No
    # full-array jnp.pad copies.
    # TODO(synk): a masked final block over the un-padded 1-D view would also
    # remove the bulk slice / concatenate copies on ragged shapes.
    flat1 = feature_1.reshape(-1)
    flat2 = feature_2.reshape(-1)
    a = jnp.float32(float(alpha))
    b = jnp.float32(1.0 - float(alpha))
    n_bulk = (n // 128) * 128
    if n_bulk == 0:
        tiny = a * flat1.astype(jnp.float32) + b * flat2.astype(jnp.float32)
        return tiny.astype(out_dtype).reshape(orig_shape)
    lane_w = next(c for c in (2048, 1024, 512, 256, 128) if n_bulk % c == 0)
    rows = n_bulk // lane_w
    bulk = _fusion_2d(
        flat1[:n_bulk].reshape(rows, lane_w),
        flat2[:n_bulk].reshape(rows, lane_w),
        alpha, out_dtype, target_tile_bytes,
    ).reshape(-1)
    tail = (a * flat1[n_bulk:].astype(jnp.float32)
            + b * flat2[n_bulk:].astype(jnp.float32)).astype(out_dtype)
    return jnp.concatenate([bulk, tail]).reshape(orig_shape)


class FMeanFusion:
    """JAX/Pallas port of the PyTorch FMeanFusion module."""

    def __init__(self, feature_dim, alpha):
        # feature_dim is unused in the original forward; kept for parity.
        self.feature_dim = feature_dim
        self.alpha = float(alpha)

    def __call__(self, feature_1, feature_2):
        return fmean_fusion(feature_1, feature_2, self.alpha)


if __name__ == "__main__":
    key = jax.random.PRNGKey(0)
    k1, k2, k3, k4 = jax.random.split(key, 4)

    alpha = 0.7
    module = FMeanFusion(feature_dim=4, alpha=alpha)

    # Primary case: small NCHW feature maps (copy-free wide-slab path).
    x_shape = (2, 4, 16, 16)
    f1 = jax.random.normal(k1, x_shape, dtype=jnp.float32)
    f2 = jax.random.normal(k2, x_shape, dtype=jnp.float32)
    out = jax.block_until_ready(module(f1, f2))
    ref = alpha * f1 + (1.0 - alpha) * f2
    assert out.shape == ref.shape and out.dtype == ref.dtype
    assert jnp.allclose(out, ref, atol=1e-6, rtol=1e-6)

    # Ragged element count: bulk-through-kernel + XLA tail fallback path.
    r_shape = (3, 5, 7, 11)
    g1 = jax.random.normal(k3, r_shape, dtype=jnp.float32)
    g2 = jax.random.normal(k4, r_shape, dtype=jnp.float32)
    out_r = jax.block_until_ready(module(g1, g2))
    ref_r = alpha * g1 + (1.0 - alpha) * g2
    assert out_r.shape == ref_r.shape and out_r.dtype == ref_r.dtype
    assert jnp.allclose(out_r, ref_r, atol=1e-6, rtol=1e-6)

    # Multi-block grid with a partial boundary block (forced small tile).
    m_shape = (2, 3, 40, 128)  # 30720 elems -> rows=15, block_rows=8, grid=(2,)
    h1 = jax.random.normal(k1, m_shape, dtype=jnp.float32)
    h2 = jax.random.normal(k2, m_shape, dtype=jnp.float32)
    out_m = jax.block_until_ready(
        fmean_fusion(h1, h2, alpha, target_tile_bytes=8 * 2048 * 4)
    )
    ref_m = alpha * h1 + (1.0 - alpha) * h2
    assert jnp.allclose(out_m, ref_m, atol=1e-6, rtol=1e-6)

    # bf16: f32 accumulation inside the kernel, output stays bf16.
    b1 = f1.astype(jnp.bfloat16)
    b2 = f2.astype(jnp.bfloat16)
    out_b = jax.block_until_ready(module(b1, b2))
    ref_b = alpha * b1 + (1.0 - alpha) * b2
    assert out_b.dtype == jnp.bfloat16
    assert jnp.allclose(
        out_b.astype(jnp.float32), ref_b.astype(jnp.float32), atol=2e-2, rtol=2e-2
    )

    # int8 inputs: PyTorch-style promotion to float32 (previously returned 0s).
    i1 = jax.random.randint(k3, (4, 8, 32), minval=-100, maxval=100,
                            dtype=jnp.int32).astype(jnp.int8)
    i2 = jax.random.randint(k4, (4, 8, 32), minval=-100, maxval=100,
                            dtype=jnp.int32).astype(jnp.int8)
    out_i = jax.block_until_ready(module(i1, i2))
    ref_i = alpha * i1 + (1.0 - alpha) * i2
    assert out_i.dtype == jnp.float32 and ref_i.dtype == jnp.float32
    assert jnp.allclose(out_i, ref_i, atol=1e-5, rtol=1e-5)

    print("KERNEL_OK")
</pallas_src>

<mosaic_0001>
module attributes {stable_mosaic.version = 11 : i64} {
  func.func @_fusion_kernel(%arg0: i32, %arg1: memref<1x2048xf32, #tpu.memory_space<vmem>>, %arg2: memref<1x2048xf32, #tpu.memory_space<vmem>>, %arg3: memref<1x2048xf32, #tpu.memory_space<vmem>>) attributes {dimension_semantics = [#tpu.dimension_semantics<parallel>], iteration_bounds = array<i64: 1>, scalar_prefetch = 0 : i64, scratch_operands = 0 : i64, tpu.core_type = #tpu.core_type<tc>, window_params = [{transform_indices = @transform_0, window_bounds = array<i64: 1, 2048>}, {transform_indices = @transform_1, window_bounds = array<i64: 1, 2048>}, {transform_indices = @transform_2, window_bounds = array<i64: 1, 2048>}]} {
    %c0 = arith.constant 0 : index
    %c0_0 = arith.constant 0 : index
    %0 = vector.load %arg1[%c0, %c0_0] : memref<1x2048xf32, #tpu.memory_space<vmem>>, vector<1x2048xf32>
    %c0_1 = arith.constant 0 : index
    %c0_2 = arith.constant 0 : index
    %1 = vector.load %arg2[%c0_1, %c0_2] : memref<1x2048xf32, #tpu.memory_space<vmem>>, vector<1x2048xf32>
    %cst = arith.constant 0.699999988 : f32
    %2 = vector.broadcast %cst : f32 to vector<1x2048xf32>
    %3 = arith.mulf %2, %0 : vector<1x2048xf32>
    %cst_3 = arith.constant 3.000000e-01 : f32
    %4 = vector.broadcast %cst_3 : f32 to vector<1x2048xf32>
    %5 = arith.mulf %4, %1 : vector<1x2048xf32>
    %6 = arith.addf %3, %5 : vector<1x2048xf32>
    %c0_4 = arith.constant 0 : index
    %c0_5 = arith.constant 0 : index
    %7 = vector.load %arg3[%c0_4, %c0_5] : memref<1x2048xf32, #tpu.memory_space<vmem>>, vector<1x2048xf32>
    tpu.vector_store %arg3[%c0_4, %c0_5], %6 {strides = array<i32>} : memref<1x2048xf32, #tpu.memory_space<vmem>>, vector<1x2048xf32>,
    return
  }
  func.func @transform_0(%arg0: i32) -> (i32, i32) {
    %c0_i32 = arith.constant 0 : i32
    %c0_i32_0 = arith.constant 0 : i32
    return %arg0, %c0_i32 : i32, i32
  }
  func.func @transform_1(%arg0: i32) -> (i32, i32) {
    %c0_i32 = arith.constant 0 : i32
    %c0_i32_0 = arith.constant 0 : i32
    return %arg0, %c0_i32 : i32, i32
  }
  func.func @transform_2(%arg0: i32) -> (i32, i32) {
    %c0_i32 = arith.constant 0 : i32
    %c0_i32_0 = arith.constant 0 : i32
    return %arg0, %c0_i32 : i32, i32
  }
}

</mosaic_0001>

<bundles_post_ra>
// kernel: tpu_custom_call.1
= control target key start
LH: loop header
LB: loop body
LE: loop exit
PB: predicated region body
PF: predicated region fallthrough
CT: control target
= control target key end

     0   :  { %7 = vsyncpa [#allocation3], 0  ;;  %s193_s0 = inlined_call_operand.hbm [shape: f32[1,2048], index: 0, kind: input, shape index: {}]   ;;  %s194_s1 = inlined_call_operand.hbm [shape: f32[1,2048], index: 1, kind: input, shape index: {}]   ;;  %s195_s2 = inlined_call_operand.hbm [shape: f32[1,2048], index: 2, kind: output, shape index: {}]  }
   0x1   :  { %8 = vsyncpa [#allocation6], 0 }
   0x2   :  { %9 = vsyncpa [#allocation4], 0  ;;  %s139_s9 = smov [#allocation2]   ;;  %s140_s11 = smov [#allocation5]  }
   0x3   :  { %s16_s10 = sshll.u32 %s139_s9, 4  ;;  %s26_s12 = sshll.u32 %s140_s11, 4  ;;  %s17_s10 = int_to_ptr.vmem [resolvable:$true] %s16_s10  ;;  %s27_s12 = int_to_ptr.vmem [resolvable:$true] %s26_s12 }
   0x4   :  { %s67_s15 = scalar_lea.hbm %s193_s0, 256 }
   0x5   :  { %p68_p0 = scmp.ne.s32.totalorder %s193_s0, %s67_s15  ;;  %p71_p1 = scmp.lt.u32.totalorder %s67_s15, %s193_s0 }
   0x7   :  { %p73_p2 = pnand %p71_p1, %p68_p0 }
   0x9   :  { %76 = shalt.err (!%p73_p2)
}
   0xa   :  { %s77_s20 = scalar_lea.vmem %s17_s10, 256  ;;  %p82_p4 = scmp.lt.s32.totalorder %s17_s10, %s17_s10 }
   0xb   :  { %p78_p3 = scmp.ne.s32.totalorder %s17_s10, %s77_s20  ;;  %p83_p5 = scmp.lt.s32.totalorder %s77_s20, %s77_s20 }
   0xd   :  { %p84_p6 = por %p83_p5, %p82_p4 }
   0xf   :  { %p85_p7 = pnand %p84_p6, %p78_p3 }
  0x11   :  { %88 = shalt.err (!%p85_p7)
}
  0x12   :  { %19 = dma.hbm_to_vmem [thread:$0]  %s193_s0, 256, %s17_s10, [#allocation3]  }
  0x13   :  { %s89_s25 = scalar_lea.hbm %s194_s1, 256 }
  0x14   :  { %p90_p8 = scmp.ne.s32.totalorder %s194_s1, %s89_s25  ;;  %p93_p9 = scmp.lt.u32.totalorder %s89_s25, %s194_s1 }
  0x16   :  { %p95_p10 = pnand %p93_p9, %p90_p8 }
  0x18   :  { %98 = shalt.err (!%p95_p10)
}
  0x19   :  { %s99_s30 = scalar_lea.vmem %s27_s12, 256  ;;  %p104_p12 = scmp.lt.s32.totalorder %s27_s12, %s27_s12 }
  0x1a   :  { %p100_p11 = scmp.ne.s32.totalorder %s27_s12, %s99_s30  ;;  %p105_p13 = scmp.lt.s32.totalorder %s99_s30, %s99_s30 }
  0x1c   :  { %p106_p0 = por %p105_p13, %p104_p12 }
  0x1e   :  { %p107_p1 = pnand %p106_p0, %p100_p11 }
  0x20   :  { %110 = shalt.err (!%p107_p1)
}
  0x21   :  { %29 = dma.hbm_to_vmem [thread:$0]  %s194_s1, 256, %s27_s12, [#allocation6]  }
  0x22   :  { %133 = dma.done.wait [#allocation3], 256  }
  0x23   :  { %134 = vsyncadd [#allocation3], 4294967040 }
  0x24   :  { %135 = dma.done.wait [#allocation6], 256  }
  0x25   :  { %136 = vsyncadd [#allocation6], 4294967040  ;;  %v36_v0 = vld [vmem:[#allocation2] sm:$0xff]  ;;  %v38_v1 = vld [vmem:[#allocation5] sm:$0xff]  ;;  %s141_s4 = smov [#allocation7]  }
  0x26   :  { %v37_v2 = vld [vmem:[#allocation2 + $0x8] sm:$0xff]  ;;  %v40_v3 = vmul.f32 0.7, %v36_v0  ;;  %v42_v4 = vmul.f32 0.3, %v38_v1  ;;  %v39_v5 = vld [vmem:[#allocation5 + $0x8] sm:$0xff] }
  0x27   :  { %s54_s5 = sshll.u32 %s141_s4, 4  ;;  %v41_v6 = vmul.f32 0.7, %v37_v2  ;;  %v43_v7 = vmul.f32 0.3, %v39_v5  ;;  %s55_s5 = int_to_ptr.vmem [resolvable:$true] %s54_s5 }
  0x28   :  { %v44_v8 = vadd.f32 %v42_v4, %v40_v3  ;;  %s111_s1 = scalar_lea.vmem %s55_s5, 256  ;;  %p116_p3 = scmp.lt.s32.totalorder %s55_s5, %s55_s5 }
  0x29   :  { %v45_v9 = vadd.f32 %v43_v7, %v41_v6  ;;  %p112_p2 = scmp.ne.s32.totalorder %s55_s5, %s111_s1  ;;  %p117_p4 = scmp.lt.s32.totalorder %s111_s1, %s111_s1 }
  0x2a   :  { %46 = vst [vmem:[#allocation7] sm:$0xff] %v44_v8 }
  0x2b   :  { %47 = vst [vmem:[#allocation7 + $0x8] sm:$0xff] %v45_v9  ;;  %p118_p5 = por %p117_p4, %p116_p3 }
  0x2d   :  { %p119_p6 = pnand %p118_p5, %p112_p2 }
  0x2f   :  { %122 = shalt.err (!%p119_p6)
}
  0x30   :  { %s123_s8 = scalar_lea.hbm %s195_s2, 256 }
  0x31   :  { %p124_p7 = scmp.ne.s32.totalorder %s195_s2, %s123_s8  ;;  %p127_p8 = scmp.lt.u32.totalorder %s123_s8, %s195_s2 }
  0x33   :  { %p129_p9 = pnand %p127_p8, %p124_p7 }
  0x35   :  { %132 = shalt.err (!%p129_p9)
}
  0x36   :  { %57 = dma.vmem_to_hbm [thread:$0]  %s55_s5, 256, %s195_s2, [#allocation4]  }
  0x37   :  { %137 = dma.done.wait [#allocation4], 256  }
  0x38   :  { %138 = vsyncadd [#allocation4], 4294967040 }
  0x39   :  { %61 = vsyncpa [#allocation3], 1 }
  0x3a   :  { %62 = vsyncpa [#allocation6], 1 }
  0x3b   :  { %63 = vsyncpa [#allocation4], 1 }

</bundles_post_ra>
